<compile_context>
chip_gen: v5e
topology: v5e:2x2
jax: 0.10.0
libtpu: 0.0.40
codegen_flags: <defaults>
</compile_context>

<pallas_src>
import functools

import jax
import jax.numpy as jnp
import numpy as np
from jax import lax
from jax.experimental import pallas as pl
from jax.experimental.pallas import tpu as pltpu


def _triplet_wrt_kernel(x_blk_ref, x_all_ref, sqc_ref, sqr_ref,
                        tcol_ref, trow_ref, loss_ref, corr_ref,
                        *, approx_recip):
    x_blk = x_blk_ref[...]                          # (TQ, Dp) query rows (f32/bf16)
    x_all = x_all_ref[...]                          # (N,  Dp) resident key matrix

    # (TQ, N) strip of the gram matrix on the MXU (contraction over lanes).
    gram = lax.dot_general(x_blk, x_all, (((1,), (1,)), ((), ())),
                           preferred_element_type=jnp.float32)

    # Pairwise euclidean distances: ||a||^2 + ||b||^2 - 2 a.b  (f32 elementwise)
    dist2 = sqc_ref[...] + sqr_ref[...] - 2.0 * gram
    dist = jnp.sqrt(jnp.maximum(dist2, 1e-12))      # (TQ, N)

    pos = tcol_ref[...] == trow_ref[...]            # (TQ, N) bool, same identity

    # ---------------- positive branch ----------------------------------------
    dist_ap = jnp.where(pos, dist, 0.0)                              # (TQ, N)
    max_ap = jnp.max(dist_ap, axis=1, keepdims=True)                 # (TQ, 1)
    em_ap = jnp.where(pos, jnp.exp(dist_ap - max_ap), 0.0)           # exp*mask once
    inv_z_ap = pl.reciprocal(jnp.sum(em_ap, axis=1, keepdims=True) + 1e-6,
                             approx=approx_recip)
    furthest_pos = jnp.sum(dist_ap * em_ap, axis=1, keepdims=True) * inv_z_ap

    # ---------------- negative branch ----------------------------------------
    # Row max of the masked -dist is provably 0 (negatives give -dist <= 0,
    # positives are masked to 0), so the stabilizer is dropped entirely.
    em_an = jnp.where(pos, 0.0, jnp.exp(-dist))                      # (TQ, N)
    inv_z_an = pl.reciprocal(jnp.sum(em_an, axis=1, keepdims=True) + 1e-6,
                             approx=approx_recip)
    closest_neg = jnp.sum(dist * em_an, axis=1, keepdims=True) * inv_z_an

    # SoftMarginLoss with target y = 1: stable softplus(-z).
    z = closest_neg - furthest_pos
    loss_ref[...] = jnp.maximum(-z, 0.0) + jnp.log1p(jnp.exp(-jnp.abs(z)))
    corr_ref[...] = (closest_neg >= furthest_pos).astype(jnp.int32)


def _vmem_capacity_bytes():
    try:
        return int(pltpu.get_tpu_info().vmem_capacity_bytes)
    except Exception:
        return 64 << 20     # conservative (v7x per-TensorCore VMEM)


def _pick_row_tile(n, dp, x_itemsize, vmem_bytes):
    """Pick TQ from a VMEM budget: resident key matrix + ~8 live (TQ,N) f32
    temporaries + double-buffered (TQ,Dp) query tile must fit with headroom."""
    if n % 8 != 0:
        return n                               # single full block (always legal)
    budget = int(0.55 * vmem_bytes) - n * dp * x_itemsize
    per_row = 8 * n * 4 + 2 * dp * x_itemsize  # (1,N) f32 temps + query row bufs
    tq = min(n, 256, max(8, budget // max(per_row, 1)))
    tq -= tq % 8
    tq = max(tq, 8)
    while n % tq != 0:
        tq -= 8
    return tq


def triplet_loss_wrt(inputs, targets, normalize_feature=False, precise=True):
    """inputs: (N, D) float embeddings; targets: (N,) int labels.

    precise=True : f32 MXU operands, exact reciprocals (matches f32 reference).
    precise=False: bf16 MXU operands + approx EUP reciprocals (fast path).
    """
    x = jnp.asarray(inputs, jnp.float32)
    t = jnp.asarray(targets, jnp.int32)
    if normalize_feature:
        norm = jnp.sqrt(jnp.sum(x * x, axis=-1, keepdims=True))
        x = x / (norm + 1e-12)

    n, d = x.shape

    # Zero-pad feature dim to a lane multiple (does not change gram / norms).
    dp = ((d + 127) // 128) * 128
    if dp != d:
        x = jnp.pad(x, ((0, 0), (0, dp - d)))

    # Squared norms computed once here, in f32.
    sq = jnp.sum(x * x, axis=1)
    sq_col = sq.reshape(n, 1)
    sq_row = sq.reshape(1, n)
    tcol = t.reshape(n, 1)
    trow = t.reshape(1, n)

    # Fast path feeds bf16 to the MXU; elementwise math stays f32 in-kernel.
    x_mxu = x if precise else x.astype(jnp.bfloat16)
    itemsize = int(jnp.dtype(x_mxu.dtype).itemsize)

    vmem_cap = _vmem_capacity_bytes()
    tq = _pick_row_tile(n, dp, itemsize, vmem_cap)
    grid = (n // tq,)

    kernel = functools.partial(_triplet_wrt_kernel, approx_recip=not precise)

    def run(single_buffer_consts):
        const_kw = (dict(pipeline_mode=pl.Buffered(1))
                    if single_buffer_consts else {})
        in_specs = [
            pl.BlockSpec((tq, dp), lambda i: (i, 0)),             # query row tile
            pl.BlockSpec((n, dp), lambda i: (0, 0), **const_kw),  # resident keys
            pl.BlockSpec((tq, 1), lambda i: (i, 0)),              # ||x||^2 column
            pl.BlockSpec((1, n), lambda i: (0, 0), **const_kw),   # ||x||^2 row
            pl.BlockSpec((tq, 1), lambda i: (i, 0)),              # targets column
            pl.BlockSpec((1, n), lambda i: (0, 0), **const_kw),   # targets row
        ]
        const_buf = 1 if single_buffer_consts else 2
        need = (const_buf * n * dp * itemsize          # resident key matrix
                + 2 * tq * dp * itemsize               # double-buffered query tile
                + 8 * tq * n * 4                       # live (TQ,N) f32 temps
                + const_buf * 2 * n * 4 + 4 * tq * 4)  # small row/col vectors
        vmem_limit = min(int(0.9 * vmem_cap),
                         max(16 << 20, 2 * need + (8 << 20)))
        return pl.pallas_call(
            kernel,
            grid=grid,
            in_specs=in_specs,
            out_specs=(
                pl.BlockSpec((tq, 1), lambda i: (i, 0)),   # per-sample loss term
                pl.BlockSpec((tq, 1), lambda i: (i, 0)),   # per-sample correct flag
            ),
            out_shape=(
                jax.ShapeDtypeStruct((n, 1), jnp.float32),
                jax.ShapeDtypeStruct((n, 1), jnp.int32),
            ),
            compiler_params=pltpu.CompilerParams(
                dimension_semantics=("parallel",),
                vmem_limit_bytes=int(vmem_limit)),
        )(x_mxu, x_mxu, sq_col, sq_row, tcol, trow)

    try:
        per_loss, per_correct = run(True)
    except Exception:
        # pl.Buffered(1) single-buffering not supported on this jax version;
        # fall back to default double-buffered constant-index blocks.
        per_loss, per_correct = run(False)

    loss = jnp.mean(per_loss)        # tiny epilogue reduce over N scalars
    correct = jnp.sum(per_correct)
    return loss, correct


def _reference_jax(inputs, targets, normalize_feature=False):
    """Pure-JAX reference mirroring the PyTorch forward (for verification)."""
    x = jnp.asarray(inputs, jnp.float32)
    t = jnp.asarray(targets, jnp.int32)
    if normalize_feature:
        x = x / (jnp.linalg.norm(x, axis=-1, keepdims=True) + 1e-12)
    sq = jnp.sum(x * x, axis=1, keepdims=True)
    gram = jnp.dot(x, x.T, precision=jax.lax.Precision.HIGHEST)
    dist = jnp.sqrt(jnp.maximum(sq + sq.T - 2.0 * gram, 1e-12))
    is_pos = (t[:, None] == t[None, :]).astype(jnp.float32)
    is_neg = 1.0 - is_pos

    def sw(d, m):
        mx = jnp.max(d * m, axis=1, keepdims=True)
        e = jnp.exp(d - mx)
        z = jnp.sum(e * m, axis=1, keepdims=True) + 1e-6
        return e * m / z

    dap, dan = dist * is_pos, dist * is_neg
    fp = jnp.sum(dap * sw(dap, is_pos), axis=1)
    cn = jnp.sum(dan * sw(-dan, is_neg), axis=1)
    loss = jnp.mean(jnp.log1p(jnp.exp(-(cn - fp))))
    correct = jnp.sum(cn >= fp)
    return loss, correct


if __name__ == "__main__":
    # Small deterministic example: N=8 samples, D=32-dim embeddings, 4 ids.
    key = jax.random.PRNGKey(0)
    N, D = 8, 32
    inputs = jax.random.normal(key, (N, D), dtype=jnp.float32)
    targets = jnp.array([0, 0, 1, 1, 2, 2, 3, 3], dtype=jnp.int32)

    # Precise (f32) path: strict check against the f32 reference.
    loss, correct = triplet_loss_wrt(inputs, targets, normalize_feature=False)
    jax.block_until_ready((loss, correct))
    ref_loss, ref_correct = _reference_jax(inputs, targets)
    np.testing.assert_allclose(np.asarray(loss), np.asarray(ref_loss),
                               rtol=1e-4, atol=1e-4)
    assert int(correct) == int(ref_correct)

    # normalize_feature path.
    loss_n, correct_n = triplet_loss_wrt(inputs, targets, normalize_feature=True)
    jax.block_until_ready((loss_n, correct_n))
    ref_loss_n, ref_correct_n = _reference_jax(inputs, targets,
                                               normalize_feature=True)
    np.testing.assert_allclose(np.asarray(loss_n), np.asarray(ref_loss_n),
                               rtol=1e-4, atol=1e-4)
    assert int(correct_n) == int(ref_correct_n)

    # Fast path (bf16 MXU operands + approx reciprocals): loose check only.
    loss_f, correct_f = triplet_loss_wrt(inputs, targets, precise=False)
    jax.block_until_ready((loss_f, correct_f))
    np.testing.assert_allclose(np.asarray(loss_f), np.asarray(ref_loss),
                               rtol=1e-1, atol=1e-1)

    print("KERNEL_OK")
</pallas_src>

<mosaic_0001>
module attributes {stable_mosaic.version = 11 : i64} {
  func.func @_triplet_wrt_kernel(%arg0: i32, %arg1: memref<8x128xf32, #tpu.memory_space<vmem>>, %arg2: memref<8x128xf32, #tpu.memory_space<vmem>>, %arg3: memref<8x1xf32, #tpu.memory_space<vmem>>, %arg4: memref<1x8xf32, #tpu.memory_space<vmem>>, %arg5: memref<8x1xi32, #tpu.memory_space<vmem>>, %arg6: memref<1x8xi32, #tpu.memory_space<vmem>>, %arg7: memref<8x1xf32, #tpu.memory_space<vmem>>, %arg8: memref<8x1xi32, #tpu.memory_space<vmem>>) attributes {dimension_semantics = [#tpu.dimension_semantics<parallel>], iteration_bounds = array<i64: 1>, scalar_prefetch = 0 : i64, scratch_operands = 0 : i64, tpu.core_type = #tpu.core_type<tc>, window_params = [{transform_indices = @transform_0, window_bounds = array<i64: 8, 128>}, {pipeline_mode = #tpu.pipeline_mode<synchronous>, transform_indices = @transform_1, window_bounds = array<i64: 8, 128>}, {transform_indices = @transform_2, window_bounds = array<i64: 8, 1>}, {pipeline_mode = #tpu.pipeline_mode<synchronous>, transform_indices = @transform_3, window_bounds = array<i64: 1, 8>}, {transform_indices = @transform_4, window_bounds = array<i64: 8, 1>}, {pipeline_mode = #tpu.pipeline_mode<synchronous>, transform_indices = @transform_5, window_bounds = array<i64: 1, 8>}, {transform_indices = @transform_6, window_bounds = array<i64: 8, 1>}, {transform_indices = @transform_7, window_bounds = array<i64: 8, 1>}]} {
    %c0 = arith.constant 0 : index
    %c0_0 = arith.constant 0 : index
    %0 = vector.load %arg1[%c0, %c0_0] : memref<8x128xf32, #tpu.memory_space<vmem>>, vector<8x128xf32>
    %c0_1 = arith.constant 0 : index
    %c0_2 = arith.constant 0 : index
    %1 = vector.load %arg2[%c0_1, %c0_2] : memref<8x128xf32, #tpu.memory_space<vmem>>, vector<8x128xf32>
    %cst = arith.constant dense<0.000000e+00> : vector<8x8xf32>
    %2 = tpu.matmul %0, %1, %cst {dimension_numbers = #tpu.dot_dimension_numbers<[1], [1], [0], [0], [0, 0, 1, 0], [], []>} : vector<8x128xf32>, vector<8x128xf32>, vector<8x8xf32> -> vector<8x8xf32>
    %c0_3 = arith.constant 0 : index
    %c0_4 = arith.constant 0 : index
    %3 = vector.load %arg3[%c0_3, %c0_4] : memref<8x1xf32, #tpu.memory_space<vmem>>, vector<8x1xf32>
    %c0_5 = arith.constant 0 : index
    %c0_6 = arith.constant 0 : index
    %4 = vector.load %arg4[%c0_5, %c0_6] : memref<1x8xf32, #tpu.memory_space<vmem>>, vector<1x8xf32>
    %5 = vector.broadcast %3 : vector<8x1xf32> to vector<8x8xf32>
    %6 = vector.broadcast %4 : vector<1x8xf32> to vector<8x8xf32>
    %7 = arith.addf %5, %6 : vector<8x8xf32>
    %cst_7 = arith.constant 2.000000e+00 : f32
    %8 = vector.broadcast %cst_7 : f32 to vector<8x8xf32>
    %9 = arith.mulf %8, %2 : vector<8x8xf32>
    %10 = arith.subf %7, %9 : vector<8x8xf32>
    %cst_8 = arith.constant 9.99999996E-13 : f32
    %11 = vector.broadcast %cst_8 : f32 to vector<8x8xf32>
    %12 = arith.maximumf %10, %11 : vector<8x8xf32>
    %13 = math.sqrt %12 : vector<8x8xf32>
    %c0_9 = arith.constant 0 : index
    %c0_10 = arith.constant 0 : index
    %14 = vector.load %arg5[%c0_9, %c0_10] : memref<8x1xi32, #tpu.memory_space<vmem>>, vector<8x1xi32>
    %c0_11 = arith.constant 0 : index
    %c0_12 = arith.constant 0 : index
    %15 = vector.load %arg6[%c0_11, %c0_12] : memref<1x8xi32, #tpu.memory_space<vmem>>, vector<1x8xi32>
    %16 = vector.broadcast %14 : vector<8x1xi32> to vector<8x8xi32>
    %17 = vector.broadcast %15 : vector<1x8xi32> to vector<8x8xi32>
    %18 = arith.cmpi eq, %16, %17 : vector<8x8xi32>
    %cst_13 = arith.constant 0.000000e+00 : f32
    %19 = vector.broadcast %cst_13 : f32 to vector<8x8xf32>
    %20 = arith.select %18, %13, %19 : vector<8x8xi1>, vector<8x8xf32>
    %cst_14 = arith.constant dense<0xFF800000> : vector<8xf32>
    %21 = vector.multi_reduction <maximumf>, %20, %cst_14 [1] : vector<8x8xf32> to vector<8xf32>
    %22 = vector.shape_cast %21 : vector<8xf32> to vector<8x1xf32>
    %23 = vector.broadcast %22 : vector<8x1xf32> to vector<8x8xf32>
    %24 = arith.subf %20, %23 : vector<8x8xf32>
    %25 = math.exp %24 : vector<8x8xf32>
    %cst_15 = arith.constant 0.000000e+00 : f32
    %26 = vector.broadcast %cst_15 : f32 to vector<8x8xf32>
    %27 = arith.select %18, %25, %26 : vector<8x8xi1>, vector<8x8xf32>
    %cst_16 = arith.constant dense<0.000000e+00> : vector<8xf32>
    %28 = vector.multi_reduction <add>, %27, %cst_16 [1] : vector<8x8xf32> to vector<8xf32>
    %29 = vector.shape_cast %28 : vector<8xf32> to vector<8x1xf32>
    %cst_17 = arith.constant 9.99999997E-7 : f32
    %30 = vector.broadcast %cst_17 : f32 to vector<8x1xf32>
    %31 = arith.addf %29, %30 : vector<8x1xf32>
    %32 = tpu.reciprocal %31 : vector<8x1xf32> -> vector<8x1xf32>
    %33 = arith.mulf %20, %27 : vector<8x8xf32>
    %cst_18 = arith.constant dense<0.000000e+00> : vector<8xf32>
    %34 = vector.multi_reduction <add>, %33, %cst_18 [1] : vector<8x8xf32> to vector<8xf32>
    %35 = vector.shape_cast %34 : vector<8xf32> to vector<8x1xf32>
    %36 = arith.mulf %35, %32 : vector<8x1xf32>
    %cst_19 = arith.constant 0.000000e+00 : f32
    %37 = vector.broadcast %cst_19 : f32 to vector<8x8xf32>
    %38 = arith.subf %37, %13 : vector<8x8xf32>
    %39 = math.exp %38 : vector<8x8xf32>
    %cst_20 = arith.constant 0.000000e+00 : f32
    %40 = vector.broadcast %cst_20 : f32 to vector<8x8xf32>
    %41 = arith.select %18, %40, %39 : vector<8x8xi1>, vector<8x8xf32>
    %cst_21 = arith.constant dense<0.000000e+00> : vector<8xf32>
    %42 = vector.multi_reduction <add>, %41, %cst_21 [1] : vector<8x8xf32> to vector<8xf32>
    %43 = vector.shape_cast %42 : vector<8xf32> to vector<8x1xf32>
    %cst_22 = arith.constant 9.99999997E-7 : f32
    %44 = vector.broadcast %cst_22 : f32 to vector<8x1xf32>
    %45 = arith.addf %43, %44 : vector<8x1xf32>
    %46 = tpu.reciprocal %45 : vector<8x1xf32> -> vector<8x1xf32>
    %47 = arith.mulf %13, %41 : vector<8x8xf32>
    %cst_23 = arith.constant dense<0.000000e+00> : vector<8xf32>
    %48 = vector.multi_reduction <add>, %47, %cst_23 [1] : vector<8x8xf32> to vector<8xf32>
    %49 = vector.shape_cast %48 : vector<8xf32> to vector<8x1xf32>
    %50 = arith.mulf %49, %46 : vector<8x1xf32>
    %51 = arith.subf %50, %36 : vector<8x1xf32>
    %cst_24 = arith.constant 0.000000e+00 : f32
    %52 = vector.broadcast %cst_24 : f32 to vector<8x1xf32>
    %53 = arith.subf %52, %51 : vector<8x1xf32>
    %cst_25 = arith.constant 0.000000e+00 : f32
    %54 = vector.broadcast %cst_25 : f32 to vector<8x1xf32>
    %55 = arith.maximumf %53, %54 : vector<8x1xf32>
    %56 = math.absf %51 : vector<8x1xf32>
    %cst_26 = arith.constant 0.000000e+00 : f32
    %57 = vector.broadcast %cst_26 : f32 to vector<8x1xf32>
    %58 = arith.subf %57, %56 : vector<8x1xf32>
    %59 = math.exp %58 : vector<8x1xf32>
    %60 = math.log1p %59 : vector<8x1xf32>
    %61 = arith.addf %55, %60 : vector<8x1xf32>
    %c0_27 = arith.constant 0 : index
    %c0_28 = arith.constant 0 : index
    %62 = vector.load %arg7[%c0_27, %c0_28] : memref<8x1xf32, #tpu.memory_space<vmem>>, vector<8x1xf32>
    tpu.vector_store %arg7[%c0_27, %c0_28], %61 {strides = array<i32>} : memref<8x1xf32, #tpu.memory_space<vmem>>, vector<8x1xf32>,
    %63 = arith.cmpf oge, %50, %36 : vector<8x1xf32>
    %64 = arith.extui %63 : vector<8x1xi1> to vector<8x1xi32>
    %c0_29 = arith.constant 0 : index
    %c0_30 = arith.constant 0 : index
    %65 = vector.load %arg8[%c0_29, %c0_30] : memref<8x1xi32, #tpu.memory_space<vmem>>, vector<8x1xi32>
    tpu.vector_store %arg8[%c0_29, %c0_30], %64 {strides = array<i32>} : memref<8x1xi32, #tpu.memory_space<vmem>>, vector<8x1xi32>,
    return
  }
  func.func @transform_0(%arg0: i32) -> (i32, i32) {
    %c0_i32 = arith.constant 0 : i32
    %c0_i32_0 = arith.constant 0 : i32
    return %arg0, %c0_i32 : i32, i32
  }
  func.func @transform_1(%arg0: i32) -> (i32, i32) {
    %c0_i32 = arith.constant 0 : i32
    %c0_i32_0 = arith.constant 0 : i32
    %c0_i32_1 = arith.constant 0 : i32
    return %c0_i32, %c0_i32_0 : i32, i32
  }
  func.func @transform_2(%arg0: i32) -> (i32, i32) {
    %c0_i32 = arith.constant 0 : i32
    %c0_i32_0 = arith.constant 0 : i32
    return %arg0, %c0_i32 : i32, i32
  }
  func.func @transform_3(%arg0: i32) -> (i32, i32) {
    %c0_i32 = arith.constant 0 : i32
    %c0_i32_0 = arith.constant 0 : i32
    %c0_i32_1 = arith.constant 0 : i32
    return %c0_i32, %c0_i32_0 : i32, i32
  }
  func.func @transform_4(%arg0: i32) -> (i32, i32) {
    %c0_i32 = arith.constant 0 : i32
    %c0_i32_0 = arith.constant 0 : i32
    return %arg0, %c0_i32 : i32, i32
  }
  func.func @transform_5(%arg0: i32) -> (i32, i32) {
    %c0_i32 = arith.constant 0 : i32
    %c0_i32_0 = arith.constant 0 : i32
    %c0_i32_1 = arith.constant 0 : i32
    return %c0_i32, %c0_i32_0 : i32, i32
  }
  func.func @transform_6(%arg0: i32) -> (i32, i32) {
    %c0_i32 = arith.constant 0 : i32
    %c0_i32_0 = arith.constant 0 : i32
    return %arg0, %c0_i32 : i32, i32
  }
  func.func @transform_7(%arg0: i32) -> (i32, i32) {
    %c0_i32 = arith.constant 0 : i32
    %c0_i32_0 = arith.constant 0 : i32
    return %arg0, %c0_i32 : i32, i32
  }
}

module attributes {stable_mosaic.version = 11 : i64} {
  func.func @_triplet_wrt_kernel(%arg0: i32, %arg1: memref<8x128xf32, #tpu.memory_space<vmem>>, %arg2: memref<8x128xf32, #tpu.memory_space<vmem>>, %arg3: memref<8x1xf32, #tpu.memory_space<vmem>>, %arg4: memref<1x8xf32, #tpu.memory_space<vmem>>, %arg5: memref<8x1xi32, #tpu.memory_space<vmem>>, %arg6: memref<1x8xi32, #tpu.memory_space<vmem>>, %arg7: memref<8x1xf32, #tpu.memory_space<vmem>>, %arg8: memref<8x1xi32, #tpu.memory_space<vmem>>) attributes {dimension_semantics = [#tpu.dimension_semantics<parallel>], iteration_bounds = array<i64: 1>, scalar_prefetch = 0 : i64, scratch_operands = 0 : i64, tpu.core_type = #tpu.core_type<tc>, window_params = [{transform_indices = @transform_0, window_bounds = array<i64: 8, 128>}, {pipeline_mode = #tpu.pipeline_mode<synchronous>, transform_indices = @transform_1, window_bounds = array<i64: 8, 128>}, {transform_indices = @transform_2, window_bounds = array<i64: 8, 1>}, {pipeline_mode = #tpu.pipeline_mode<synchronous>, transform_indices = @transform_3, window_bounds = array<i64: 1, 8>}, {transform_indices = @transform_4, window_bounds = array<i64: 8, 1>}, {pipeline_mode = #tpu.pipeline_mode<synchronous>, transform_indices = @transform_5, window_bounds = array<i64: 1, 8>}, {transform_indices = @transform_6, window_bounds = array<i64: 8, 1>}, {transform_indices = @transform_7, window_bounds = array<i64: 8, 1>}]} {
    %c0 = arith.constant 0 : index
    %c0_0 = arith.constant 0 : index
    %0 = vector.load %arg1[%c0, %c0_0] : memref<8x128xf32, #tpu.memory_space<vmem>>, vector<8x128xf32>
    %c0_1 = arith.constant 0 : index
    %c0_2 = arith.constant 0 : index
    %1 = vector.load %arg2[%c0_1, %c0_2] : memref<8x128xf32, #tpu.memory_space<vmem>>, vector<8x128xf32>
    %cst = arith.constant dense<0.000000e+00> : vector<8x8xf32>
    %2 = tpu.matmul %0, %1, %cst {dimension_numbers = #tpu.dot_dimension_numbers<[1], [1], [0], [0], [0, 0, 1, 0], [], []>} : vector<8x128xf32>, vector<8x128xf32>, vector<8x8xf32> -> vector<8x8xf32>
    %c0_3 = arith.constant 0 : index
    %c0_4 = arith.constant 0 : index
    %3 = vector.load %arg3[%c0_3, %c0_4] : memref<8x1xf32, #tpu.memory_space<vmem>>, vector<8x1xf32>
    %c0_5 = arith.constant 0 : index
    %c0_6 = arith.constant 0 : index
    %4 = vector.load %arg4[%c0_5, %c0_6] : memref<1x8xf32, #tpu.memory_space<vmem>>, vector<1x8xf32>
    %5 = vector.broadcast %3 : vector<8x1xf32> to vector<8x8xf32>
    %6 = vector.broadcast %4 : vector<1x8xf32> to vector<8x8xf32>
    %7 = arith.addf %5, %6 : vector<8x8xf32>
    %cst_7 = arith.constant 2.000000e+00 : f32
    %8 = vector.broadcast %cst_7 : f32 to vector<8x8xf32>
    %9 = arith.mulf %8, %2 : vector<8x8xf32>
    %10 = arith.subf %7, %9 : vector<8x8xf32>
    %cst_8 = arith.constant 9.99999996E-13 : f32
    %11 = vector.broadcast %cst_8 : f32 to vector<8x8xf32>
    %12 = arith.maximumf %10, %11 : vector<8x8xf32>
    %13 = math.sqrt %12 : vector<8x8xf32>
    %c0_9 = arith.constant 0 : index
    %c0_10 = arith.constant 0 : index
    %14 = vector.load %arg5[%c0_9, %c0_10] : memref<8x1xi32, #tpu.memory_space<vmem>>, vector<8x1xi32>
    %c0_11 = arith.constant 0 : index
    %c0_12 = arith.constant 0 : index
    %15 = vector.load %arg6[%c0_11, %c0_12] : memref<1x8xi32, #tpu.memory_space<vmem>>, vector<1x8xi32>
    %16 = vector.broadcast %14 : vector<8x1xi32> to vector<8x8xi32>
    %17 = vector.broadcast %15 : vector<1x8xi32> to vector<8x8xi32>
    %18 = arith.cmpi eq, %16, %17 : vector<8x8xi32>
    %cst_13 = arith.constant 0.000000e+00 : f32
    %19 = vector.broadcast %cst_13 : f32 to vector<8x8xf32>
    %20 = arith.select %18, %13, %19 : vector<8x8xi1>, vector<8x8xf32>
    %cst_14 = arith.constant dense<0xFF800000> : vector<8xf32>
    %21 = vector.multi_reduction <maximumf>, %20, %cst_14 [1] : vector<8x8xf32> to vector<8xf32>
    %22 = vector.shape_cast %21 : vector<8xf32> to vector<8x1xf32>
    %23 = vector.broadcast %22 : vector<8x1xf32> to vector<8x8xf32>
    %24 = arith.subf %20, %23 : vector<8x8xf32>
    %25 = math.exp %24 : vector<8x8xf32>
    %cst_15 = arith.constant 0.000000e+00 : f32
    %26 = vector.broadcast %cst_15 : f32 to vector<8x8xf32>
    %27 = arith.select %18, %25, %26 : vector<8x8xi1>, vector<8x8xf32>
    %cst_16 = arith.constant dense<0.000000e+00> : vector<8xf32>
    %28 = vector.multi_reduction <add>, %27, %cst_16 [1] : vector<8x8xf32> to vector<8xf32>
    %29 = vector.shape_cast %28 : vector<8xf32> to vector<8x1xf32>
    %cst_17 = arith.constant 9.99999997E-7 : f32
    %30 = vector.broadcast %cst_17 : f32 to vector<8x1xf32>
    %31 = arith.addf %29, %30 : vector<8x1xf32>
    %32 = tpu.reciprocal %31 : vector<8x1xf32> -> vector<8x1xf32>
    %33 = arith.mulf %20, %27 : vector<8x8xf32>
    %cst_18 = arith.constant dense<0.000000e+00> : vector<8xf32>
    %34 = vector.multi_reduction <add>, %33, %cst_18 [1] : vector<8x8xf32> to vector<8xf32>
    %35 = vector.shape_cast %34 : vector<8xf32> to vector<8x1xf32>
    %36 = arith.mulf %35, %32 : vector<8x1xf32>
    %cst_19 = arith.constant 0.000000e+00 : f32
    %37 = vector.broadcast %cst_19 : f32 to vector<8x8xf32>
    %38 = arith.subf %37, %13 : vector<8x8xf32>
    %39 = math.exp %38 : vector<8x8xf32>
    %cst_20 = arith.constant 0.000000e+00 : f32
    %40 = vector.broadcast %cst_20 : f32 to vector<8x8xf32>
    %41 = arith.select %18, %40, %39 : vector<8x8xi1>, vector<8x8xf32>
    %cst_21 = arith.constant dense<0.000000e+00> : vector<8xf32>
    %42 = vector.multi_reduction <add>, %41, %cst_21 [1] : vector<8x8xf32> to vector<8xf32>
    %43 = vector.shape_cast %42 : vector<8xf32> to vector<8x1xf32>
    %cst_22 = arith.constant 9.99999997E-7 : f32
    %44 = vector.broadcast %cst_22 : f32 to vector<8x1xf32>
    %45 = arith.addf %43, %44 : vector<8x1xf32>
    %46 = tpu.reciprocal %45 : vector<8x1xf32> -> vector<8x1xf32>
    %47 = arith.mulf %13, %41 : vector<8x8xf32>
    %cst_23 = arith.constant dense<0.000000e+00> : vector<8xf32>
    %48 = vector.multi_reduction <add>, %47, %cst_23 [1] : vector<8x8xf32> to vector<8xf32>
    %49 = vector.shape_cast %48 : vector<8xf32> to vector<8x1xf32>
    %50 = arith.mulf %49, %46 : vector<8x1xf32>
    %51 = arith.subf %50, %36 : vector<8x1xf32>
    %cst_24 = arith.constant 0.000000e+00 : f32
    %52 = vector.broadcast %cst_24 : f32 to vector<8x1xf32>
    %53 = arith.subf %52, %51 : vector<8x1xf32>
    %cst_25 = arith.constant 0.000000e+00 : f32
    %54 = vector.broadcast %cst_25 : f32 to vector<8x1xf32>
    %55 = arith.maximumf %53, %54 : vector<8x1xf32>
    %56 = math.absf %51 : vector<8x1xf32>
    %cst_26 = arith.constant 0.000000e+00 : f32
    %57 = vector.broadcast %cst_26 : f32 to vector<8x1xf32>
    %58 = arith.subf %57, %56 : vector<8x1xf32>
    %59 = math.exp %58 : vector<8x1xf32>
    %60 = math.log1p %59 : vector<8x1xf32>
    %61 = arith.addf %55, %60 : vector<8x1xf32>
    %c0_27 = arith.constant 0 : index
    %c0_28 = arith.constant 0 : index
    %62 = vector.load %arg7[%c0_27, %c0_28] : memref<8x1xf32, #tpu.memory_space<vmem>>, vector<8x1xf32>
    tpu.vector_store %arg7[%c0_27, %c0_28], %61 {strides = array<i32>} : memref<8x1xf32, #tpu.memory_space<vmem>>, vector<8x1xf32>,
    %63 = arith.cmpf oge, %50, %36 : vector<8x1xf32>
    %64 = arith.extui %63 : vector<8x1xi1> to vector<8x1xi32>
    %c0_29 = arith.constant 0 : index
    %c0_30 = arith.constant 0 : index
    %65 = vector.load %arg8[%c0_29, %c0_30] : memref<8x1xi32, #tpu.memory_space<vmem>>, vector<8x1xi32>
    tpu.vector_store %arg8[%c0_29, %c0_30], %64 {strides = array<i32>} : memref<8x1xi32, #tpu.memory_space<vmem>>, vector<8x1xi32>,
    return
  }
  func.func @transform_0(%arg0: i32) -> (i32, i32) {
    %c0_i32 = arith.constant 0 : i32
    %c0_i32_0 = arith.constant 0 : i32
    return %arg0, %c0_i32 : i32, i32
  }
  func.func @transform_1(%arg0: i32) -> (i32, i32) {
    %c0_i32 = arith.constant 0 : i32
    %c0_i32_0 = arith.constant 0 : i32
    %c0_i32_1 = arith.constant 0 : i32
    return %c0_i32, %c0_i32_0 : i32, i32
  }
  func.func @transform_2(%arg0: i32) -> (i32, i32) {
    %c0_i32 = arith.constant 0 : i32
    %c0_i32_0 = arith.constant 0 : i32
    return %arg0, %c0_i32 : i32, i32
  }
  func.func @transform_3(%arg0: i32) -> (i32, i32) {
    %c0_i32 = arith.constant 0 : i32
    %c0_i32_0 = arith.constant 0 : i32
    %c0_i32_1 = arith.constant 0 : i32
    return %c0_i32, %c0_i32_0 : i32, i32
  }
  func.func @transform_4(%arg0: i32) -> (i32, i32) {
    %c0_i32 = arith.constant 0 : i32
    %c0_i32_0 = arith.constant 0 : i32
    return %arg0, %c0_i32 : i32, i32
  }
  func.func @transform_5(%arg0: i32) -> (i32, i32) {
    %c0_i32 = arith.constant 0 : i32
    %c0_i32_0 = arith.constant 0 : i32
    %c0_i32_1 = arith.constant 0 : i32
    return %c0_i32, %c0_i32_0 : i32, i32
  }
  func.func @transform_6(%arg0: i32) -> (i32, i32) {
    %c0_i32 = arith.constant 0 : i32
    %c0_i32_0 = arith.constant 0 : i32
    return %arg0, %c0_i32 : i32, i32
  }
  func.func @transform_7(%arg0: i32) -> (i32, i32) {
    %c0_i32 = arith.constant 0 : i32
    %c0_i32_0 = arith.constant 0 : i32
    return %arg0, %c0_i32 : i32, i32
  }
}

</mosaic_0001>

<bundles_post_ra>
// kernel: tpu_custom_call.1
= control target key start
LH: loop header
LB: loop body
LE: loop exit
PB: predicated region body
PF: predicated region fallthrough
CT: control target
= control target key end

     0   :  { %v187_v1 = vmov 0   ;;  %vm81_vm2 = vcmask 64512   ;;  %vm156_vm12 = vcmask 7168   ;;  %s264_s1 = inlined_call_operand.vmem [shape: f32[8,128], index: 1, kind: input, shape index: {}]   ;;  %s265_s0 = inlined_call_operand.vmem [shape: f32[8,128], index: 0, kind: input, shape index: {}]   ;;  %s266_s2 = inlined_call_operand.vmem [shape: f32[8,1], index: 2, kind: input, shape index: {}]   ;;  %s267_s3 = inlined_call_operand.vmem [shape: f32[1,8], index: 3, kind: input, shape index: {}]   ;;  %s268_s5 = inlined_call_operand.vmem [shape: s32[1,8], index: 5, kind: input, shape index: {}]   ;;  %s269_s4 = inlined_call_operand.vmem [shape: s32[8,1], index: 4, kind: input, shape index: {}]   ;;  %s270_s7 = inlined_call_operand.vmem [shape: s32[8,1], index: 7, kind: output, shape index: {1}]   ;;  %s271_s6 = inlined_call_operand.vmem [shape: f32[8,1], index: 6, kind: output, shape index: {0}]  }
   0x1   :  { %v26_v0 = vld [vmem:[%s264_s1] sm:$0xff]  ;;  %170 = vset.pattern.permute.xlu0 %v187_v1 }
   0x2   :  { %v47_v2 = vld [vmem:[%s266_s2] sm:$0xff]  ;;  %42 = vmatpush.xpose.msra.mxu0 %v26_v0 }
   0x3   :  { %v25_v3 = vld [vmem:[%s265_s0] sm:$0xff]  ;;  %51 = vperm.xlu0 %170, %v47_v2  }
   0x4   :  { %v73_v4 = vld [vmem:[%s269_s4] sm:$0xff] }
   0x5   :  { %43 = vmatmul.f32.vlgmr.msra.gmra.mxu0 %v25_v3  ;;  %v171_v5 = vld [vmem:[%s267_s3] ss:$0 sm:$0xff] }
   0x6   :  { %v172_v18 = vld [vmem:[%s268_s5] ss:$0 sm:$0xff] }
   0xb   :  { %76 = vperm.xlu0 %170, %v73_v4  }
  0x75   :  { %v52_v6 = vpop.permute.xlu0 %51 }
  0x76   :  { %v57_v7 = vadd.f32 %v171_v5, %v52_v6 }
  0x7d   :  { %v77_v19 = vpop.permute.xlu0 %76 }
  0x7e   :  { %vm79_vm3 = vcmp.eq.s32.totalorder %v77_v19, %v172_v18 }
  0x82   :  { %v44_v8 = vpop.f32.mrf.mxu0 }
  0x83   :  { %v58_v9 = vmul.f32 2.0, %v44_v8 }
  0x85   :  { %v59_v10 = vsub.f32 %v57_v7, %v58_v9 }
  0x87   :  { %v60_v11 = vmax.f32 %v59_v10, 1e-12 }
  0x89   :  { %173 = vrsqrt.f32 %v60_v11  ;;  %vm68_vm0 = vcmp.eq.f32.partialorder %v60_v11, inf  ;;  %v71_v21 = vand.u32 2147483648, %v60_v11  ;;  %vm70_vm1 = vcmp.eq.f32.partialorder %v60_v11, 0.0 }
  0x8f   :  { %v174_v12 = vpop.eup %173 }
  0x90   :  { %v62_v13 = vmul.f32 %v174_v12, %v60_v11 }
  0x92   :  { %v63_v14 = vmul.f32 %v174_v12, %v62_v13 }
  0x94   :  { %v64_v15 = vmul.f32 0.5, %v63_v14 }
  0x96   :  { %v65_v16 = vsub.f32 1.5, %v64_v15 }
  0x98   :  { %v66_v17 = vmul.f32 %v174_v12, %v65_v16 }
  0x9a   :  { %v67_v20 = vmul.f32 %v66_v17, %v60_v11 }
  0x9c   :  { %v69_v22 = vsel %vm68_vm0, %v60_v11, %v67_v20 }
  0x9d   :  { %v72_v23 = vsel %vm70_vm1, %v71_v21, %v69_v22 }
  0x9e   :  { %v80_v24 = vsel %vm79_vm3, %v72_v23, 0.0  ;;  %v112_v25 = vsub.f32 0.0, %v72_v23 }
  0x9f   :  { %v82_v26 = vsel %vm81_vm2, %v80_v24, -inf }
  0xa0   :  { %v113_v27 = vmul.f32 1.442695, %v112_v25  ;;  %83 = vmax.xlane.f32.xlu1 %v82_v26 }
  0xa2   :  { %175 = vpow2.f32 %v113_v27 }
  0xa8   :  { %v176_v28 = vpop.eup %175 }
  0xa9   :  { %v115_v29 = vsel %vm79_vm3, 0.0, %v176_v28 }
  0xaa   :  { %v116_v30 = vsel %vm81_vm2, %v115_v29, 0.0  ;;  %v134_v31 = vmul.f32 %v115_v29, %v72_v23 }
  0xab   :  { %117 = vadd.xlane.f32.xlu2 %v116_v30 }
  0xac   :  { %v135_v32 = vsel %vm81_vm2, %v134_v31, 0.0 }
  0xad   :  { %136 = vadd.xlane.f32.xlu0 %v135_v32 }
 0x113   :  { %v84_v33 = vpop.xlane.xlu1 %83 }
 0x114   :  { %v85_v34 = vsub.f32 %v80_v24, %v84_v33 }
 0x116   :  { %v86_v35 = vmul.f32 1.442695, %v85_v34 }
 0x118   :  { %177 = vpow2.f32 %v86_v35 }
 0x11e   :  { %v178_v36 = vpop.eup %177  ;;  %v118_v41 = vpop.xlane.xlu2 %117 }
 0x11f   :  { %v88_v37 = vsel %vm79_vm3, %v178_v36, 0.0  ;;  %v119_v42 = vadd.f32 1e-06, %v118_v41 }
 0x120   :  { %v89_v38 = vsel %vm81_vm2, %v88_v37, 0.0  ;;  %v107_v39 = vmul.f32 %v88_v37, %v80_v24  ;;  %v137_v0 = vpop.xlane.xlu0 %136 }
 0x121   :  { %90 = vadd.xlane.f32.xlu1 %v89_v38  ;;  %179 = vrcp.f32 %v119_v42  ;;  %v131_v52 = vand.u32 2147483648, %v119_v42  ;;  %vm125_vm5 = vweird.f32 %v119_v42  ;;  %v129_v53 = vand.u32 2147483647, %v119_v42 }
 0x122   :  { %v108_v40 = vsel %vm81_vm2, %v107_v39, 0.0 }
 0x123   :  { %109 = vadd.xlane.f32.xlu2 %v108_v40  ;;  %v132_v59 = vor.u32 1.1754944e-38, %v131_v52  ;;  %vm130_vm8 = vcmp.eq.f32.partialorder %v129_v53, 8.507059e+37 }
 0x127   :  { %v180_v43 = vpop.eup %179 }
 0x128   :  { %v121_v44 = vmul.f32 %v180_v43, %v119_v42  ;;  %vm126_vm4 = vweird.f32 %v180_v43 }
 0x129   :  { %vm127_vm6 = vmor %vm125_vm5, %vm126_vm4 }
 0x12a   :  { %v122_v47 = vsub.f32 1.0, %v121_v44 }
 0x12c   :  { %v123_v48 = vmul.f32 %v180_v43, %v122_v47 }
 0x12e   :  { %v124_v50 = vadd.f32 %v180_v43, %v123_v48 }
 0x130   :  { %v128_v56 = vsel %vm127_vm6, %v180_v43, %v124_v50 }
 0x131   :  { %v133_v61 = vsel %vm130_vm8, %v132_v59, %v128_v56 }
 0x132   :  { %v138_v4 = vmul.f32 %v137_v0, %v133_v61 }
 0x194   :  { %v91_v45 = vpop.xlane.xlu1 %90 }
 0x195   :  { %v92_v46 = vadd.f32 1e-06, %v91_v45 }
 0x196   :  { %v110_v2 = vpop.xlane.xlu2 %109 }
 0x197   :  { %181 = vrcp.f32 %v92_v46  ;;  %v104_v55 = vand.u32 2147483648, %v92_v46  ;;  %v102_v58 = vand.u32 2147483647, %v92_v46  ;;  %vm98_vm9 = vweird.f32 %v92_v46 }
 0x199   :  { %v105_v62 = vor.u32 1.1754944e-38, %v104_v55  ;;  %vm103_vm11 = vcmp.eq.f32.partialorder %v102_v58, 8.507059e+37 }
 0x19d   :  { %v182_v49 = vpop.eup %181 }
 0x19e   :  { %v94_v51 = vmul.f32 %v182_v49, %v92_v46  ;;  %vm99_vm7 = vweird.f32 %v182_v49 }
 0x19f   :  { %vm100_vm10 = vmor %vm98_vm9, %vm99_vm7 }
 0x1a0   :  { %v95_v54 = vsub.f32 1.0, %v94_v51 }
 0x1a2   :  { %v96_v57 = vmul.f32 %v182_v49, %v95_v54 }
 0x1a4   :  { %v97_v60 = vadd.f32 %v182_v49, %v96_v57 }
 0x1a6   :  { %v101_v63 = vsel %vm100_vm10, %v182_v49, %v97_v60 }
 0x1a7   :  { %v106_v3 = vsel %vm103_vm11, %v105_v62, %v101_v63 }
 0x1a8   :  { %v111_v5 = vmul.f32 %v110_v2, %v106_v3 }
 0x1aa   :  { %v139_v6 = vsub.f32 %v138_v4, %v111_v5  ;;  %vm158_vm13 = vcmp.ge.f32.partialorder %v138_v4, %v111_v5 }
 0x1ab   :  { %v159_v7 = vsel %vm158_vm13, 1, %v187_v1 }
 0x1ac   :  { %v142_v8 = vand.u32 2147483647, %v139_v6  ;;  %160 = vst.msk [vmem:[%s270_s7] sm:$0xff] %vm156_vm12, %v159_v7  ;;  %v140_v15 = vsub.f32 0.0, %v139_v6 }
 0x1ae   :  { %v143_v9 = vsub.f32 0.0, %v142_v8  ;;  %v141_v1 = vmax.f32 %v140_v15, 0.0 }
 0x1b0   :  { %v144_v10 = vmul.f32 1.442695, %v143_v9 }
 0x1b2   :  { %183 = vpow2.f32 %v144_v10 }
 0x1b8   :  { %v184_v11 = vpop.eup %183 }
 0x1b9   :  { %v146_v12 = vadd.f32 1.0, %v184_v11  ;;  %v149_v13 = vmul.f32 -0.5, %v184_v11  ;;  %v152_v16 = vand.u32 2147483647, %v184_v11 }
 0x1bb   :  { %185 = vlog2.f32 %v146_v12  ;;  %v150_v14 = vadd.f32 1.0, %v149_v13  ;;  %vm153_vm14 = vcmp.lt.f32.partialorder %v152_v16, 0.0004427343 }
 0x1bd   :  { %v151_v19 = vmul.f32 %v184_v11, %v150_v14 }
 0x1c1   :  { %v186_v17 = vpop.eup %185 }
 0x1c2   :  { %v148_v18 = vmul.f32 0.6931472, %v186_v17 }
 0x1c4   :  { %v154_v20 = vsel %vm153_vm14, %v151_v19, %v148_v18 }
 0x1c5   :  { %v155_v21 = vadd.f32 %v154_v20, %v141_v1 }
 0x1c7   :  { %157 = vst.msk [vmem:[%s271_s6] sm:$0xff] %vm156_vm12, %v155_v21 }

// kernel: tpu_custom_call.1
= control target key start
LH: loop header
LB: loop body
LE: loop exit
PB: predicated region body
PF: predicated region fallthrough
CT: control target
= control target key end

     0   :  { %v187_v1 = vmov 0   ;;  %vm81_vm2 = vcmask 64512   ;;  %vm156_vm12 = vcmask 7168   ;;  %s264_s1 = inlined_call_operand.vmem [shape: f32[8,128], index: 1, kind: input, shape index: {}]   ;;  %s265_s0 = inlined_call_operand.vmem [shape: f32[8,128], index: 0, kind: input, shape index: {}]   ;;  %s266_s2 = inlined_call_operand.vmem [shape: f32[8,1], index: 2, kind: input, shape index: {}]   ;;  %s267_s3 = inlined_call_operand.vmem [shape: f32[1,8], index: 3, kind: input, shape index: {}]   ;;  %s268_s5 = inlined_call_operand.vmem [shape: s32[1,8], index: 5, kind: input, shape index: {}]   ;;  %s269_s4 = inlined_call_operand.vmem [shape: s32[8,1], index: 4, kind: input, shape index: {}]   ;;  %s270_s7 = inlined_call_operand.vmem [shape: s32[8,1], index: 7, kind: output, shape index: {1}]   ;;  %s271_s6 = inlined_call_operand.vmem [shape: f32[8,1], index: 6, kind: output, shape index: {0}]  }
   0x1   :  { %v26_v0 = vld [vmem:[%s264_s1] sm:$0xff]  ;;  %170 = vset.pattern.permute.xlu0 %v187_v1 }
   0x2   :  { %v47_v2 = vld [vmem:[%s266_s2] sm:$0xff]  ;;  %42 = vmatpush.xpose.msra.mxu0 %v26_v0 }
   0x3   :  { %v25_v3 = vld [vmem:[%s265_s0] sm:$0xff]  ;;  %51 = vperm.xlu0 %170, %v47_v2  }
   0x4   :  { %v73_v4 = vld [vmem:[%s269_s4] sm:$0xff] }
   0x5   :  { %43 = vmatmul.f32.vlgmr.msra.gmra.mxu0 %v25_v3  ;;  %v171_v5 = vld [vmem:[%s267_s3] ss:$0 sm:$0xff] }
   0x6   :  { %v172_v18 = vld [vmem:[%s268_s5] ss:$0 sm:$0xff] }
   0xb   :  { %76 = vperm.xlu0 %170, %v73_v4  }
  0x75   :  { %v52_v6 = vpop.permute.xlu0 %51 }
  0x76   :  { %v57_v7 = vadd.f32 %v171_v5, %v52_v6 }
  0x7d   :  { %v77_v19 = vpop.permute.xlu0 %76 }
  0x7e   :  { %vm79_vm3 = vcmp.eq.s32.totalorder %v77_v19, %v172_v18 }
  0x82   :  { %v44_v8 = vpop.f32.mrf.mxu0 }
  0x83   :  { %v58_v9 = vmul.f32 2.0, %v44_v8 }
  0x85   :  { %v59_v10 = vsub.f32 %v57_v7, %v58_v9 }
  0x87   :  { %v60_v11 = vmax.f32 %v59_v10, 1e-12 }
  0x89   :  { %173 = vrsqrt.f32 %v60_v11  ;;  %vm68_vm0 = vcmp.eq.f32.partialorder %v60_v11, inf  ;;  %v71_v21 = vand.u32 2147483648, %v60_v11  ;;  %vm70_vm1 = vcmp.eq.f32.partialorder %v60_v11, 0.0 }
  0x8f   :  { %v174_v12 = vpop.eup %173 }
  0x90   :  { %v62_v13 = vmul.f32 %v174_v12, %v60_v11 }
  0x92   :  { %v63_v14 = vmul.f32 %v174_v12, %v62_v13 }
  0x94   :  { %v64_v15 = vmul.f32 0.5, %v63_v14 }
  0x96   :  { %v65_v16 = vsub.f32 1.5, %v64_v15 }
  0x98   :  { %v66_v17 = vmul.f32 %v174_v12, %v65_v16 }
  0x9a   :  { %v67_v20 = vmul.f32 %v66_v17, %v60_v11 }
  0x9c   :  { %v69_v22 = vsel %vm68_vm0, %v60_v11, %v67_v20 }
  0x9d   :  { %v72_v23 = vsel %vm70_vm1, %v71_v21, %v69_v22 }
  0x9e   :  { %v80_v24 = vsel %vm79_vm3, %v72_v23, 0.0  ;;  %v112_v25 = vsub.f32 0.0, %v72_v23 }
  0x9f   :  { %v82_v26 = vsel %vm81_vm2, %v80_v24, -inf }
  0xa0   :  { %v113_v27 = vmul.f32 1.442695, %v112_v25  ;;  %83 = vmax.xlane.f32.xlu1 %v82_v26 }
  0xa2   :  { %175 = vpow2.f32 %v113_v27 }
  0xa8   :  { %v176_v28 = vpop.eup %175 }
  0xa9   :  { %v115_v29 = vsel %vm79_vm3, 0.0, %v176_v28 }
  0xaa   :  { %v116_v30 = vsel %vm81_vm2, %v115_v29, 0.0  ;;  %v134_v31 = vmul.f32 %v115_v29, %v72_v23 }
  0xab   :  { %117 = vadd.xlane.f32.xlu2 %v116_v30 }
  0xac   :  { %v135_v32 = vsel %vm81_vm2, %v134_v31, 0.0 }
  0xad   :  { %136 = vadd.xlane.f32.xlu0 %v135_v32 }
 0x113   :  { %v84_v33 = vpop.xlane.xlu1 %83 }
 0x114   :  { %v85_v34 = vsub.f32 %v80_v24, %v84_v33 }
 0x116   :  { %v86_v35 = vmul.f32 1.442695, %v85_v34 }
 0x118   :  { %177 = vpow2.f32 %v86_v35 }
 0x11e   :  { %v178_v36 = vpop.eup %177  ;;  %v118_v41 = vpop.xlane.xlu2 %117 }
 0x11f   :  { %v88_v37 = vsel %vm79_vm3, %v178_v36, 0.0  ;;  %v119_v42 = vadd.f32 1e-06, %v118_v41 }
 0x120   :  { %v89_v38 = vsel %vm81_vm2, %v88_v37, 0.0  ;;  %v107_v39 = vmul.f32 %v88_v37, %v80_v24  ;;  %v137_v0 = vpop.xlane.xlu0 %136 }
 0x121   :  { %90 = vadd.xlane.f32.xlu1 %v89_v38  ;;  %179 = vrcp.f32 %v119_v42  ;;  %v131_v52 = vand.u32 2147483648, %v119_v42  ;;  %vm125_vm5 = vweird.f32 %v119_v42  ;;  %v129_v53 = vand.u32 2147483647, %v119_v42 }
 0x122   :  { %v108_v40 = vsel %vm81_vm2, %v107_v39, 0.0 }
 0x123   :  { %109 = vadd.xlane.f32.xlu2 %v108_v40  ;;  %v132_v59 = vor.u32 1.1754944e-38, %v131_v52  ;;  %vm130_vm8 = vcmp.eq.f32.partialorder %v129_v53, 8.507059e+37 }
 0x127   :  { %v180_v43 = vpop.eup %179 }
 0x128   :  { %v121_v44 = vmul.f32 %v180_v43, %v119_v42  ;;  %vm126_vm4 = vweird.f32 %v180_v43 }
 0x129   :  { %vm127_vm6 = vmor %vm125_vm5, %vm126_vm4 }
 0x12a   :  { %v122_v47 = vsub.f32 1.0, %v121_v44 }
 0x12c   :  { %v123_v48 = vmul.f32 %v180_v43, %v122_v47 }
 0x12e   :  { %v124_v50 = vadd.f32 %v180_v43, %v123_v48 }
 0x130   :  { %v128_v56 = vsel %vm127_vm6, %v180_v43, %v124_v50 }
 0x131   :  { %v133_v61 = vsel %vm130_vm8, %v132_v59, %v128_v56 }
 0x132   :  { %v138_v4 = vmul.f32 %v137_v0, %v133_v61 }
 0x194   :  { %v91_v45 = vpop.xlane.xlu1 %90 }
 0x195   :  { %v92_v46 = vadd.f32 1e-06, %v91_v45 }
 0x196   :  { %v110_v2 = vpop.xlane.xlu2 %109 }
 0x197   :  { %181 = vrcp.f32 %v92_v46  ;;  %v104_v55 = vand.u32 2147483648, %v92_v46  ;;  %v102_v58 = vand.u32 2147483647, %v92_v46  ;;  %vm98_vm9 = vweird.f32 %v92_v46 }
 0x199   :  { %v105_v62 = vor.u32 1.1754944e-38, %v104_v55  ;;  %vm103_vm11 = vcmp.eq.f32.partialorder %v102_v58, 8.507059e+37 }
 0x19d   :  { %v182_v49 = vpop.eup %181 }
 0x19e   :  { %v94_v51 = vmul.f32 %v182_v49, %v92_v46  ;;  %vm99_vm7 = vweird.f32 %v182_v49 }
 0x19f   :  { %vm100_vm10 = vmor %vm98_vm9, %vm99_vm7 }
 0x1a0   :  { %v95_v54 = vsub.f32 1.0, %v94_v51 }
 0x1a2   :  { %v96_v57 = vmul.f32 %v182_v49, %v95_v54 }
 0x1a4   :  { %v97_v60 = vadd.f32 %v182_v49, %v96_v57 }
 0x1a6   :  { %v101_v63 = vsel %vm100_vm10, %v182_v49, %v97_v60 }
 0x1a7   :  { %v106_v3 = vsel %vm103_vm11, %v105_v62, %v101_v63 }
 0x1a8   :  { %v111_v5 = vmul.f32 %v110_v2, %v106_v3 }
 0x1aa   :  { %v139_v6 = vsub.f32 %v138_v4, %v111_v5  ;;  %vm158_vm13 = vcmp.ge.f32.partialorder %v138_v4, %v111_v5 }
 0x1ab   :  { %v159_v7 = vsel %vm158_vm13, 1, %v187_v1 }
 0x1ac   :  { %v142_v8 = vand.u32 2147483647, %v139_v6  ;;  %160 = vst.msk [vmem:[%s270_s7] sm:$0xff] %vm156_vm12, %v159_v7  ;;  %v140_v15 = vsub.f32 0.0, %v139_v6 }
 0x1ae   :  { %v143_v9 = vsub.f32 0.0, %v142_v8  ;;  %v141_v1 = vmax.f32 %v140_v15, 0.0 }
 0x1b0   :  { %v144_v10 = vmul.f32 1.442695, %v143_v9 }
 0x1b2   :  { %183 = vpow2.f32 %v144_v10 }
 0x1b8   :  { %v184_v11 = vpop.eup %183 }
 0x1b9   :  { %v146_v12 = vadd.f32 1.0, %v184_v11  ;;  %v149_v13 = vmul.f32 -0.5, %v184_v11  ;;  %v152_v16 = vand.u32 2147483647, %v184_v11 }
 0x1bb   :  { %185 = vlog2.f32 %v146_v12  ;;  %v150_v14 = vadd.f32 1.0, %v149_v13  ;;  %vm153_vm14 = vcmp.lt.f32.partialorder %v152_v16, 0.0004427343 }
 0x1bd   :  { %v151_v19 = vmul.f32 %v184_v11, %v150_v14 }
 0x1c1   :  { %v186_v17 = vpop.eup %185 }
 0x1c2   :  { %v148_v18 = vmul.f32 0.6931472, %v186_v17 }
 0x1c4   :  { %v154_v20 = vsel %vm153_vm14, %v151_v19, %v148_v18 }
 0x1c5   :  { %v155_v21 = vadd.f32 %v154_v20, %v141_v1 }
 0x1c7   :  { %157 = vst.msk [vmem:[%s271_s6] sm:$0xff] %vm156_vm12, %v155_v21 }

</bundles_post_ra>
